<compile_context>
chip_gen: v7x
topology: tpu7x:2x2x1
jax: 0.10.0
libtpu: 0.0.40
codegen_flags: <defaults>
</compile_context>

<pallas_src>
import math

import jax
import jax.numpy as jnp
import numpy as np
from jax.experimental import pallas as pl
from jax.experimental.pallas import tpu as pltpu

PE_POINTS = 6                      # net_conf['arch']['PE_conf']['points']
PE_DIRS = 4                        # net_conf['arch']['PE_conf']['dirs']
C_PTS = 3 + 6 * PE_POINTS          # 39
C_DIRS = 3 + 6 * PE_DIRS           # 27

_FREQ_P = [float((2.0 ** l) * math.pi) for l in range(PE_POINTS)]
_FREQ_D = [float((2.0 ** l) * math.pi) for l in range(PE_DIRS)]

# TODO(synk): Encoder.vector_extractor (image-feature sampling at the raster
# coordinates) and the Nerf_creator MLPs (self.coarse / self.fine) are not
# defined in the provided source and are therefore not implemented here.


def pe_kernel(pts_ref, dirs_ref, pts_pe_ref, dirs_pe_ref):
    """Positional encoding of a (3, TP) tile of points and dirs.

    Output channel ordering matches NeRF.PE exactly:
      [x, y, z,
       sin(x f0), sin(y f0), sin(z f0), cos(x f0), cos(y f0), cos(z f0),
       sin(x f1), ...]
    """
    od = pts_pe_ref.dtype
    pts = pts_ref[0]      # (3, TP)
    drs = dirs_ref[0]     # (3, TP)

    # raw xyz channels
    pts_pe_ref[0, 0:3, :] = pts.astype(od)
    dirs_pe_ref[0, 0:3, :] = drs.astype(od)

    # One packed argument slab: rows [pts*f_0 .. pts*f_5 | dirs*g_0 .. dirs*g_3]
    # -> (3*(PE_POINTS+PE_DIRS), TP) = (30, TP).  A single sin and a single cos
    # over the whole slab keep the EUP vregs sublane-dense instead of issuing
    # 60 (1, TP) transcendental pushes per tile.
    blocks = [pts * f for f in _FREQ_P] + [drs * f for f in _FREQ_D]
    tr = jnp.concatenate(blocks, axis=0)                    # (30, TP)
    s = jnp.sin(tr).astype(od)
    c = jnp.cos(tr).astype(od)

    # Direct strided row-block stores (no big concatenate of the result).
    for l in range(PE_POINTS):
        r = 3 * l
        pts_pe_ref[0, 3 + 6 * l:6 + 6 * l, :] = s[r:r + 3, :]
        pts_pe_ref[0, 6 + 6 * l:9 + 6 * l, :] = c[r:r + 3, :]
    off = 3 * PE_POINTS
    for l in range(PE_DIRS):
        r = off + 3 * l
        dirs_pe_ref[0, 3 + 6 * l:6 + 6 * l, :] = s[r:r + 3, :]
        dirs_pe_ref[0, 6 + 6 * l:9 + 6 * l, :] = c[r:r + 3, :]


def raster_kernel(pose_ref, sc_ref, pts0_ref, raster_ref):
    """Per-batch: camera = p0 @ R^T + t ; perspective projection -> raster."""
    focal = sc_ref[0, 0]
    px = sc_ref[0, 1]
    py = sc_ref[0, 2]
    x = pts0_ref[0, 0:1, :]
    y = pts0_ref[0, 1:2, :]
    z = pts0_ref[0, 2:3, :]
    cam = []
    for cch in range(3):
        cam.append(pose_ref[0, 4 * cch + 0] * x
                   + pose_ref[0, 4 * cch + 1] * y
                   + pose_ref[0, 4 * cch + 2] * z
                   + pose_ref[0, 4 * cch + 3])
    inv_z = pl.reciprocal(cam[2], approx=False)   # exact: keeps 1e-4 raster tol
    raster_ref[0, 0:1, :] = (-cam[0] * inv_z) * focal + px
    raster_ref[0, 1:2, :] = (-cam[1] * inv_z) * (-focal) + py


def _pick_tile_units(n_units, want_units):
    """Largest t <= want_units that divides n_units (both in 128-lane units)."""
    t = max(1, min(want_units, n_units))
    while n_units % t:
        t -= 1
    return t


def nerf_forward(points, dirs, w2cpose, focal, prcpal_p, *,
                 tile_p=8192, pe_dtype=None, channels_last=True):
    """points, dirs: (B, R, S, 3); w2cpose: (B, 3, 4); focal: (B,);
    prcpal_p: (B, 2).

    Returns (PEd_points (B,R,S,39), PEd_dirs (B,R,S,27), raster (B,R,2)).
    With channels_last=False, the PE outputs are returned channels-first
    ((B,39,P), (B,27,P), (B,2,R)) which skips the output transposes when the
    downstream MLP consumes that layout. pe_dtype=jnp.bfloat16 halves the
    dominant output writeback (changes numerics; default keeps input dtype)."""
    B, R, S, _ = points.shape
    P = R * S
    f32 = jnp.float32
    pe_dtype = points.dtype if pe_dtype is None else pe_dtype

    # ---- flatten, pad P to a lane multiple, go channels-first (lane-dense) ---
    P_pad = ((P + 127) // 128) * 128
    pts_flat = points.reshape(B, P, 3).astype(f32)
    dirs_flat = dirs.reshape(B, P, 3).astype(f32)
    if P_pad != P:
        pad = ((0, 0), (0, P_pad - P), (0, 0))
        pts_flat = jnp.pad(pts_flat, pad)
        dirs_flat = jnp.pad(dirs_flat, pad)
    pts_cf = jnp.transpose(pts_flat, (0, 2, 1))      # (B, 3, P_pad)
    dirs_cf = jnp.transpose(dirs_flat, (0, 2, 1))    # (B, 3, P_pad)

    # ---- lane tile: as large as divides P (biggest single perf lever) -------
    n_units = P_pad // 128
    t_units = _pick_tile_units(n_units, max(1, tile_p // 128))
    if B * (n_units // t_units) < 2 and n_units >= 2:
        # keep >= 2 grid steps so both v7x TensorCores get work
        t_units = _pick_tile_units(n_units, max(1, n_units // 2))
    tp = 128 * t_units
    grid = (B, P_pad // tp)

    pts_pe_cf, dirs_pe_cf = pl.pallas_call(
        pe_kernel,
        out_shape=(jax.ShapeDtypeStruct((B, C_PTS, P_pad), pe_dtype),
                   jax.ShapeDtypeStruct((B, C_DIRS, P_pad), pe_dtype)),
        grid_spec=pltpu.PrefetchScalarGridSpec(
            num_scalar_prefetch=0,
            grid=grid,
            in_specs=[pl.BlockSpec((1, 3, tp), lambda b, p: (b, 0, p)),
                      pl.BlockSpec((1, 3, tp), lambda b, p: (b, 0, p))],
            out_specs=[pl.BlockSpec((1, C_PTS, tp), lambda b, p: (b, 0, p)),
                       pl.BlockSpec((1, C_DIRS, tp), lambda b, p: (b, 0, p))]),
        compiler_params=pltpu.CompilerParams(
            dimension_semantics=("parallel", "parallel"),
            vmem_limit_bytes=32 * 1024 * 1024),
    )(pts_cf, dirs_cf)

    # ---- raster path: first-sample points only (per ray, not per sample) ----
    pose_flat = w2cpose.reshape(B, 12).astype(f32)                   # (B, 12)
    scalars = jnp.stack([focal, prcpal_p[:, 0], prcpal_p[:, 1]],
                        axis=-1).astype(f32)                         # (B, 3)
    pts0_cf = jnp.transpose(points[:, :, 0, :], (0, 2, 1)).astype(f32)  # (B,3,R)

    raster_cf = pl.pallas_call(
        raster_kernel,
        out_shape=jax.ShapeDtypeStruct((B, 2, R), f32),
        grid_spec=pltpu.PrefetchScalarGridSpec(
            num_scalar_prefetch=0,
            grid=(B,),
            in_specs=[pl.BlockSpec((1, 12), lambda b: (b, 0),
                                   memory_space=pltpu.MemorySpace.SMEM),
                      pl.BlockSpec((1, 3), lambda b: (b, 0),
                                   memory_space=pltpu.MemorySpace.SMEM),
                      pl.BlockSpec((1, 3, R), lambda b: (b, 0, 0))],
            out_specs=pl.BlockSpec((1, 2, R), lambda b: (b, 0, 0))),
        compiler_params=pltpu.CompilerParams(
            dimension_semantics=("parallel",)),
    )(pose_flat, scalars, pts0_cf)

    pts_pe_cf = pts_pe_cf[:, :, :P]
    dirs_pe_cf = dirs_pe_cf[:, :, :P]
    if not channels_last:
        return pts_pe_cf, dirs_pe_cf, raster_cf

    # Torch-layout glue (only needed if the consumer requires channels-last).
    pts_pe = jnp.transpose(pts_pe_cf, (0, 2, 1)).reshape(B, R, S, C_PTS)
    dirs_pe = jnp.transpose(dirs_pe_cf, (0, 2, 1)).reshape(B, R, S, C_DIRS)
    raster = jnp.transpose(raster_cf, (0, 2, 1))                     # (B, R, 2)
    return pts_pe, dirs_pe, raster


# ------------------------------ pure-JAX reference ---------------------------
def _pe_ref(inpt, rep):
    L = jnp.arange(rep)
    vector = (2.0 ** L) * np.pi
    tr = inpt[..., None] * vector                                  # (B,R,S,3,rep)
    out = jnp.concatenate([jnp.sin(tr), jnp.cos(tr)], axis=3)      # (B,R,S,6,rep)
    out = jnp.transpose(out, (0, 1, 2, 4, 3))
    out = out.reshape(*inpt.shape[:3], 6 * rep)
    return jnp.concatenate([inpt, out], axis=3)


def reference_forward(points, dirs, w2cpose, focal, prcpal_p):
    pts_pe = _pe_ref(points, PE_POINTS)
    dirs_pe = _pe_ref(dirs, PE_DIRS)
    rot = w2cpose[:, :, :3]                                        # (B,3,3)
    t = w2cpose[:, :, 3]                                           # (B,3)
    cam = jnp.einsum('brk,bck->brc', points[:, :, 0, :], rot) + t[:, None, :]
    rast = -cam[..., :2] / cam[..., 2:]
    rx = rast[..., 0] * focal[:, None]
    ry = rast[..., 1] * (-focal[:, None])
    rast = jnp.stack([rx, ry], axis=-1) + prcpal_p[:, None, :]
    return pts_pe, dirs_pe, rast


if __name__ == "__main__":
    B, R, S = 2, 8, 16                         # P = R*S = 128
    key = jax.random.PRNGKey(0)
    k1, k2, k3, k4, k5, k6 = jax.random.split(key, 6)

    points = jax.random.uniform(k1, (B, R, S, 3), jnp.float32, -1.0, 1.0)
    dirs = jax.random.normal(k2, (B, R, S, 3), jnp.float32)
    rot = jnp.eye(3)[None] + 0.1 * jax.random.normal(k3, (B, 3, 3))
    trans = jax.random.normal(k4, (B, 3, 1)) * 0.2
    trans = trans.at[:, 2, :].set(4.0)         # keep camera z well away from 0
    w2cpose = jnp.concatenate([rot, trans], axis=-1).astype(jnp.float32)
    focal = jax.random.uniform(k5, (B,), jnp.float32, 1.0, 2.0)
    prcpal_p = jax.random.uniform(k6, (B, 2), jnp.float32, -0.5, 0.5)

    pts_pe, dirs_pe, raster = nerf_forward(points, dirs, w2cpose,
                                           focal, prcpal_p)
    jax.block_until_ready((pts_pe, dirs_pe, raster))

    r_pts, r_dirs, r_rast = reference_forward(points, dirs, w2cpose,
                                              focal, prcpal_p)
    assert pts_pe.shape == (B, R, S, C_PTS) and pts_pe.dtype == jnp.float32
    assert dirs_pe.shape == (B, R, S, C_DIRS)
    assert raster.shape == (B, R, 2)
    np.testing.assert_allclose(np.asarray(pts_pe), np.asarray(r_pts),
                               rtol=1e-4, atol=1e-4)
    np.testing.assert_allclose(np.asarray(dirs_pe), np.asarray(r_dirs),
                               rtol=1e-4, atol=1e-4)
    np.testing.assert_allclose(np.asarray(raster), np.asarray(r_rast),
                               rtol=1e-4, atol=1e-4)
    print("KERNEL_OK")
</pallas_src>

<mosaic_0001>
module attributes {stable_mosaic.version = 11 : i64} {
  func.func @pe_kernel(%arg0: i32, %arg1: i32, %arg2: memref<1x3x128xf32, #tpu.memory_space<vmem>>, %arg3: memref<1x3x128xf32, #tpu.memory_space<vmem>>, %arg4: memref<1x39x128xf32, #tpu.memory_space<vmem>>, %arg5: memref<1x27x128xf32, #tpu.memory_space<vmem>>) attributes {dimension_semantics = [#tpu.dimension_semantics<parallel>, #tpu.dimension_semantics<parallel>], iteration_bounds = array<i64: 2, 1>, scalar_prefetch = 0 : i64, scratch_operands = 0 : i64, tpu.core_type = #tpu.core_type<tc>, window_params = [{transform_indices = @transform_0, window_bounds = array<i64: 1, 3, 128>}, {transform_indices = @transform_1, window_bounds = array<i64: 1, 3, 128>}, {transform_indices = @transform_2, window_bounds = array<i64: 1, 39, 128>}, {transform_indices = @transform_3, window_bounds = array<i64: 1, 27, 128>}]} {
    %c0 = arith.constant 0 : index
    %c0_0 = arith.constant 0 : index
    %c0_1 = arith.constant 0 : index
    %0 = vector.load %arg2[%c0, %c0_0, %c0_1] : memref<1x3x128xf32, #tpu.memory_space<vmem>>, vector<1x3x128xf32>
    %1 = vector.shape_cast %0 : vector<1x3x128xf32> to vector<3x128xf32>
    %c0_2 = arith.constant 0 : index
    %c0_3 = arith.constant 0 : index
    %c0_4 = arith.constant 0 : index
    %2 = vector.load %arg3[%c0_2, %c0_3, %c0_4] : memref<1x3x128xf32, #tpu.memory_space<vmem>>, vector<1x3x128xf32>
    %3 = vector.shape_cast %2 : vector<1x3x128xf32> to vector<3x128xf32>
    %c0_5 = arith.constant 0 : index
    %c0_6 = arith.constant 0 : index
    %c0_7 = arith.constant 0 : index
    %4 = vector.load %arg4[%c0_5, %c0_6, %c0_7] : memref<1x39x128xf32, #tpu.memory_space<vmem>>, vector<1x3x128xf32>
    %5 = vector.shape_cast %4 : vector<1x3x128xf32> to vector<3x128xf32>
    %6 = vector.shape_cast %1 : vector<3x128xf32> to vector<1x3x128xf32>
    tpu.vector_store %arg4[%c0_5, %c0_6, %c0_7], %6 {strides = array<i32>} : memref<1x39x128xf32, #tpu.memory_space<vmem>>, vector<1x3x128xf32>,
    %c0_8 = arith.constant 0 : index
    %c0_9 = arith.constant 0 : index
    %c0_10 = arith.constant 0 : index
    %7 = vector.load %arg5[%c0_8, %c0_9, %c0_10] : memref<1x27x128xf32, #tpu.memory_space<vmem>>, vector<1x3x128xf32>
    %8 = vector.shape_cast %7 : vector<1x3x128xf32> to vector<3x128xf32>
    %9 = vector.shape_cast %3 : vector<3x128xf32> to vector<1x3x128xf32>
    tpu.vector_store %arg5[%c0_8, %c0_9, %c0_10], %9 {strides = array<i32>} : memref<1x27x128xf32, #tpu.memory_space<vmem>>, vector<1x3x128xf32>,
    %cst = arith.constant 3.14159274 : f32
    %10 = vector.broadcast %cst : f32 to vector<3x128xf32>
    %11 = arith.mulf %1, %10 : vector<3x128xf32>
    %cst_11 = arith.constant 6.28318548 : f32
    %12 = vector.broadcast %cst_11 : f32 to vector<3x128xf32>
    %13 = arith.mulf %1, %12 : vector<3x128xf32>
    %cst_12 = arith.constant 12.566371 : f32
    %14 = vector.broadcast %cst_12 : f32 to vector<3x128xf32>
    %15 = arith.mulf %1, %14 : vector<3x128xf32>
    %cst_13 = arith.constant 25.1327419 : f32
    %16 = vector.broadcast %cst_13 : f32 to vector<3x128xf32>
    %17 = arith.mulf %1, %16 : vector<3x128xf32>
    %cst_14 = arith.constant 50.2654839 : f32
    %18 = vector.broadcast %cst_14 : f32 to vector<3x128xf32>
    %19 = arith.mulf %1, %18 : vector<3x128xf32>
    %cst_15 = arith.constant 100.530968 : f32
    %20 = vector.broadcast %cst_15 : f32 to vector<3x128xf32>
    %21 = arith.mulf %1, %20 : vector<3x128xf32>
    %cst_16 = arith.constant 3.14159274 : f32
    %22 = vector.broadcast %cst_16 : f32 to vector<3x128xf32>
    %23 = arith.mulf %3, %22 : vector<3x128xf32>
    %cst_17 = arith.constant 6.28318548 : f32
    %24 = vector.broadcast %cst_17 : f32 to vector<3x128xf32>
    %25 = arith.mulf %3, %24 : vector<3x128xf32>
    %cst_18 = arith.constant 12.566371 : f32
    %26 = vector.broadcast %cst_18 : f32 to vector<3x128xf32>
    %27 = arith.mulf %3, %26 : vector<3x128xf32>
    %cst_19 = arith.constant 25.1327419 : f32
    %28 = vector.broadcast %cst_19 : f32 to vector<3x128xf32>
    %29 = arith.mulf %3, %28 : vector<3x128xf32>
    %30 = tpu.concatenate %11, %13, %15, %17, %19, %21, %23, %25, %27, %29 in 0 : vector<3x128xf32>, vector<3x128xf32>, vector<3x128xf32>, vector<3x128xf32>, vector<3x128xf32>, vector<3x128xf32>, vector<3x128xf32>, vector<3x128xf32>, vector<3x128xf32>, vector<3x128xf32> -> vector<30x128xf32>
    %31 = math.sin %30 : vector<30x128xf32>
    %32 = math.cos %30 : vector<30x128xf32>
    %33 = vector.extract_strided_slice %31 {offsets = [0, 0], sizes = [3, 128], strides = [1, 1]} : vector<30x128xf32> to vector<3x128xf32>
    %c0_20 = arith.constant 0 : index
    %c3 = arith.constant 3 : index
    %c0_21 = arith.constant 0 : index
    %34 = vector.load %arg4[%c0_20, %c3, %c0_21] : memref<1x39x128xf32, #tpu.memory_space<vmem>>, vector<1x3x128xf32>
    %35 = vector.shape_cast %34 : vector<1x3x128xf32> to vector<3x128xf32>
    %36 = vector.shape_cast %33 : vector<3x128xf32> to vector<1x3x128xf32>
    tpu.vector_store %arg4[%c0_20, %c3, %c0_21], %36 {strides = array<i32>} : memref<1x39x128xf32, #tpu.memory_space<vmem>>, vector<1x3x128xf32>,
    %37 = vector.extract_strided_slice %32 {offsets = [0, 0], sizes = [3, 128], strides = [1, 1]} : vector<30x128xf32> to vector<3x128xf32>
    %c0_22 = arith.constant 0 : index
    %c6 = arith.constant 6 : index
    %c0_23 = arith.constant 0 : index
    %38 = vector.load %arg4[%c0_22, %c6, %c0_23] : memref<1x39x128xf32, #tpu.memory_space<vmem>>, vector<1x3x128xf32>
    %39 = vector.shape_cast %38 : vector<1x3x128xf32> to vector<3x128xf32>
    %40 = vector.shape_cast %37 : vector<3x128xf32> to vector<1x3x128xf32>
    tpu.vector_store %arg4[%c0_22, %c6, %c0_23], %40 {strides = array<i32>} : memref<1x39x128xf32, #tpu.memory_space<vmem>>, vector<1x3x128xf32>,
    %41 = vector.extract_strided_slice %31 {offsets = [3, 0], sizes = [3, 128], strides = [1, 1]} : vector<30x128xf32> to vector<3x128xf32>
    %c0_24 = arith.constant 0 : index
    %c9 = arith.constant 9 : index
    %c0_25 = arith.constant 0 : index
    %42 = vector.load %arg4[%c0_24, %c9, %c0_25] : memref<1x39x128xf32, #tpu.memory_space<vmem>>, vector<1x3x128xf32>
    %43 = vector.shape_cast %42 : vector<1x3x128xf32> to vector<3x128xf32>
    %44 = vector.shape_cast %41 : vector<3x128xf32> to vector<1x3x128xf32>
    tpu.vector_store %arg4[%c0_24, %c9, %c0_25], %44 {strides = array<i32>} : memref<1x39x128xf32, #tpu.memory_space<vmem>>, vector<1x3x128xf32>,
    %45 = vector.extract_strided_slice %32 {offsets = [3, 0], sizes = [3, 128], strides = [1, 1]} : vector<30x128xf32> to vector<3x128xf32>
    %c0_26 = arith.constant 0 : index
    %c12 = arith.constant 12 : index
    %c0_27 = arith.constant 0 : index
    %46 = vector.load %arg4[%c0_26, %c12, %c0_27] : memref<1x39x128xf32, #tpu.memory_space<vmem>>, vector<1x3x128xf32>
    %47 = vector.shape_cast %46 : vector<1x3x128xf32> to vector<3x128xf32>
    %48 = vector.shape_cast %45 : vector<3x128xf32> to vector<1x3x128xf32>
    tpu.vector_store %arg4[%c0_26, %c12, %c0_27], %48 {strides = array<i32>} : memref<1x39x128xf32, #tpu.memory_space<vmem>>, vector<1x3x128xf32>,
    %49 = vector.extract_strided_slice %31 {offsets = [6, 0], sizes = [3, 128], strides = [1, 1]} : vector<30x128xf32> to vector<3x128xf32>
    %c0_28 = arith.constant 0 : index
    %c15 = arith.constant 15 : index
    %c0_29 = arith.constant 0 : index
    %50 = vector.load %arg4[%c0_28, %c15, %c0_29] : memref<1x39x128xf32, #tpu.memory_space<vmem>>, vector<1x3x128xf32>
    %51 = vector.shape_cast %50 : vector<1x3x128xf32> to vector<3x128xf32>
    %52 = vector.shape_cast %49 : vector<3x128xf32> to vector<1x3x128xf32>
    tpu.vector_store %arg4[%c0_28, %c15, %c0_29], %52 {strides = array<i32>} : memref<1x39x128xf32, #tpu.memory_space<vmem>>, vector<1x3x128xf32>,
    %53 = vector.extract_strided_slice %32 {offsets = [6, 0], sizes = [3, 128], strides = [1, 1]} : vector<30x128xf32> to vector<3x128xf32>
    %c0_30 = arith.constant 0 : index
    %c18 = arith.constant 18 : index
    %c0_31 = arith.constant 0 : index
    %54 = vector.load %arg4[%c0_30, %c18, %c0_31] : memref<1x39x128xf32, #tpu.memory_space<vmem>>, vector<1x3x128xf32>
    %55 = vector.shape_cast %54 : vector<1x3x128xf32> to vector<3x128xf32>
    %56 = vector.shape_cast %53 : vector<3x128xf32> to vector<1x3x128xf32>
    tpu.vector_store %arg4[%c0_30, %c18, %c0_31], %56 {strides = array<i32>} : memref<1x39x128xf32, #tpu.memory_space<vmem>>, vector<1x3x128xf32>,
    %57 = vector.extract_strided_slice %31 {offsets = [9, 0], sizes = [3, 128], strides = [1, 1]} : vector<30x128xf32> to vector<3x128xf32>
    %c0_32 = arith.constant 0 : index
    %c21 = arith.constant 21 : index
    %c0_33 = arith.constant 0 : index
    %58 = vector.load %arg4[%c0_32, %c21, %c0_33] : memref<1x39x128xf32, #tpu.memory_space<vmem>>, vector<1x3x128xf32>
    %59 = vector.shape_cast %58 : vector<1x3x128xf32> to vector<3x128xf32>
    %60 = vector.shape_cast %57 : vector<3x128xf32> to vector<1x3x128xf32>
    tpu.vector_store %arg4[%c0_32, %c21, %c0_33], %60 {strides = array<i32>} : memref<1x39x128xf32, #tpu.memory_space<vmem>>, vector<1x3x128xf32>,
    %61 = vector.extract_strided_slice %32 {offsets = [9, 0], sizes = [3, 128], strides = [1, 1]} : vector<30x128xf32> to vector<3x128xf32>
    %c0_34 = arith.constant 0 : index
    %c24 = arith.constant 24 : index
    %c0_35 = arith.constant 0 : index
    %62 = vector.load %arg4[%c0_34, %c24, %c0_35] : memref<1x39x128xf32, #tpu.memory_space<vmem>>, vector<1x3x128xf32>
    %63 = vector.shape_cast %62 : vector<1x3x128xf32> to vector<3x128xf32>
    %64 = vector.shape_cast %61 : vector<3x128xf32> to vector<1x3x128xf32>
    tpu.vector_store %arg4[%c0_34, %c24, %c0_35], %64 {strides = array<i32>} : memref<1x39x128xf32, #tpu.memory_space<vmem>>, vector<1x3x128xf32>,
    %65 = vector.extract_strided_slice %31 {offsets = [12, 0], sizes = [3, 128], strides = [1, 1]} : vector<30x128xf32> to vector<3x128xf32>
    %c0_36 = arith.constant 0 : index
    %c27 = arith.constant 27 : index
    %c0_37 = arith.constant 0 : index
    %66 = vector.load %arg4[%c0_36, %c27, %c0_37] : memref<1x39x128xf32, #tpu.memory_space<vmem>>, vector<1x3x128xf32>
    %67 = vector.shape_cast %66 : vector<1x3x128xf32> to vector<3x128xf32>
    %68 = vector.shape_cast %65 : vector<3x128xf32> to vector<1x3x128xf32>
    tpu.vector_store %arg4[%c0_36, %c27, %c0_37], %68 {strides = array<i32>} : memref<1x39x128xf32, #tpu.memory_space<vmem>>, vector<1x3x128xf32>,
    %69 = vector.extract_strided_slice %32 {offsets = [12, 0], sizes = [3, 128], strides = [1, 1]} : vector<30x128xf32> to vector<3x128xf32>
    %c0_38 = arith.constant 0 : index
    %c30 = arith.constant 30 : index
    %c0_39 = arith.constant 0 : index
    %70 = vector.load %arg4[%c0_38, %c30, %c0_39] : memref<1x39x128xf32, #tpu.memory_space<vmem>>, vector<1x3x128xf32>
    %71 = vector.shape_cast %70 : vector<1x3x128xf32> to vector<3x128xf32>
    %72 = vector.shape_cast %69 : vector<3x128xf32> to vector<1x3x128xf32>
    tpu.vector_store %arg4[%c0_38, %c30, %c0_39], %72 {strides = array<i32>} : memref<1x39x128xf32, #tpu.memory_space<vmem>>, vector<1x3x128xf32>,
    %73 = vector.extract_strided_slice %31 {offsets = [15, 0], sizes = [3, 128], strides = [1, 1]} : vector<30x128xf32> to vector<3x128xf32>
    %c0_40 = arith.constant 0 : index
    %c33 = arith.constant 33 : index
    %c0_41 = arith.constant 0 : index
    %74 = vector.load %arg4[%c0_40, %c33, %c0_41] : memref<1x39x128xf32, #tpu.memory_space<vmem>>, vector<1x3x128xf32>
    %75 = vector.shape_cast %74 : vector<1x3x128xf32> to vector<3x128xf32>
    %76 = vector.shape_cast %73 : vector<3x128xf32> to vector<1x3x128xf32>
    tpu.vector_store %arg4[%c0_40, %c33, %c0_41], %76 {strides = array<i32>} : memref<1x39x128xf32, #tpu.memory_space<vmem>>, vector<1x3x128xf32>,
    %77 = vector.extract_strided_slice %32 {offsets = [15, 0], sizes = [3, 128], strides = [1, 1]} : vector<30x128xf32> to vector<3x128xf32>
    %c0_42 = arith.constant 0 : index
    %c36 = arith.constant 36 : index
    %c0_43 = arith.constant 0 : index
    %78 = vector.load %arg4[%c0_42, %c36, %c0_43] : memref<1x39x128xf32, #tpu.memory_space<vmem>>, vector<1x3x128xf32>
    %79 = vector.shape_cast %78 : vector<1x3x128xf32> to vector<3x128xf32>
    %80 = vector.shape_cast %77 : vector<3x128xf32> to vector<1x3x128xf32>
    tpu.vector_store %arg4[%c0_42, %c36, %c0_43], %80 {strides = array<i32>} : memref<1x39x128xf32, #tpu.memory_space<vmem>>, vector<1x3x128xf32>,
    %81 = vector.extract_strided_slice %31 {offsets = [18, 0], sizes = [3, 128], strides = [1, 1]} : vector<30x128xf32> to vector<3x128xf32>
    %c0_44 = arith.constant 0 : index
    %c3_45 = arith.constant 3 : index
    %c0_46 = arith.constant 0 : index
    %82 = vector.load %arg5[%c0_44, %c3_45, %c0_46] : memref<1x27x128xf32, #tpu.memory_space<vmem>>, vector<1x3x128xf32>
    %83 = vector.shape_cast %82 : vector<1x3x128xf32> to vector<3x128xf32>
    %84 = vector.shape_cast %81 : vector<3x128xf32> to vector<1x3x128xf32>
    tpu.vector_store %arg5[%c0_44, %c3_45, %c0_46], %84 {strides = array<i32>} : memref<1x27x128xf32, #tpu.memory_space<vmem>>, vector<1x3x128xf32>,
    %85 = vector.extract_strided_slice %32 {offsets = [18, 0], sizes = [3, 128], strides = [1, 1]} : vector<30x128xf32> to vector<3x128xf32>
    %c0_47 = arith.constant 0 : index
    %c6_48 = arith.constant 6 : index
    %c0_49 = arith.constant 0 : index
    %86 = vector.load %arg5[%c0_47, %c6_48, %c0_49] : memref<1x27x128xf32, #tpu.memory_space<vmem>>, vector<1x3x128xf32>
    %87 = vector.shape_cast %86 : vector<1x3x128xf32> to vector<3x128xf32>
    %88 = vector.shape_cast %85 : vector<3x128xf32> to vector<1x3x128xf32>
    tpu.vector_store %arg5[%c0_47, %c6_48, %c0_49], %88 {strides = array<i32>} : memref<1x27x128xf32, #tpu.memory_space<vmem>>, vector<1x3x128xf32>,
    %89 = vector.extract_strided_slice %31 {offsets = [21, 0], sizes = [3, 128], strides = [1, 1]} : vector<30x128xf32> to vector<3x128xf32>
    %c0_50 = arith.constant 0 : index
    %c9_51 = arith.constant 9 : index
    %c0_52 = arith.constant 0 : index
    %90 = vector.load %arg5[%c0_50, %c9_51, %c0_52] : memref<1x27x128xf32, #tpu.memory_space<vmem>>, vector<1x3x128xf32>
    %91 = vector.shape_cast %90 : vector<1x3x128xf32> to vector<3x128xf32>
    %92 = vector.shape_cast %89 : vector<3x128xf32> to vector<1x3x128xf32>
    tpu.vector_store %arg5[%c0_50, %c9_51, %c0_52], %92 {strides = array<i32>} : memref<1x27x128xf32, #tpu.memory_space<vmem>>, vector<1x3x128xf32>,
    %93 = vector.extract_strided_slice %32 {offsets = [21, 0], sizes = [3, 128], strides = [1, 1]} : vector<30x128xf32> to vector<3x128xf32>
    %c0_53 = arith.constant 0 : index
    %c12_54 = arith.constant 12 : index
    %c0_55 = arith.constant 0 : index
    %94 = vector.load %arg5[%c0_53, %c12_54, %c0_55] : memref<1x27x128xf32, #tpu.memory_space<vmem>>, vector<1x3x128xf32>
    %95 = vector.shape_cast %94 : vector<1x3x128xf32> to vector<3x128xf32>
    %96 = vector.shape_cast %93 : vector<3x128xf32> to vector<1x3x128xf32>
    tpu.vector_store %arg5[%c0_53, %c12_54, %c0_55], %96 {strides = array<i32>} : memref<1x27x128xf32, #tpu.memory_space<vmem>>, vector<1x3x128xf32>,
    %97 = vector.extract_strided_slice %31 {offsets = [24, 0], sizes = [3, 128], strides = [1, 1]} : vector<30x128xf32> to vector<3x128xf32>
    %c0_56 = arith.constant 0 : index
    %c15_57 = arith.constant 15 : index
    %c0_58 = arith.constant 0 : index
    %98 = vector.load %arg5[%c0_56, %c15_57, %c0_58] : memref<1x27x128xf32, #tpu.memory_space<vmem>>, vector<1x3x128xf32>
    %99 = vector.shape_cast %98 : vector<1x3x128xf32> to vector<3x128xf32>
    %100 = vector.shape_cast %97 : vector<3x128xf32> to vector<1x3x128xf32>
    tpu.vector_store %arg5[%c0_56, %c15_57, %c0_58], %100 {strides = array<i32>} : memref<1x27x128xf32, #tpu.memory_space<vmem>>, vector<1x3x128xf32>,
    %101 = vector.extract_strided_slice %32 {offsets = [24, 0], sizes = [3, 128], strides = [1, 1]} : vector<30x128xf32> to vector<3x128xf32>
    %c0_59 = arith.constant 0 : index
    %c18_60 = arith.constant 18 : index
    %c0_61 = arith.constant 0 : index
    %102 = vector.load %arg5[%c0_59, %c18_60, %c0_61] : memref<1x27x128xf32, #tpu.memory_space<vmem>>, vector<1x3x128xf32>
    %103 = vector.shape_cast %102 : vector<1x3x128xf32> to vector<3x128xf32>
    %104 = vector.shape_cast %101 : vector<3x128xf32> to vector<1x3x128xf32>
    tpu.vector_store %arg5[%c0_59, %c18_60, %c0_61], %104 {strides = array<i32>} : memref<1x27x128xf32, #tpu.memory_space<vmem>>, vector<1x3x128xf32>,
    %105 = vector.extract_strided_slice %31 {offsets = [27, 0], sizes = [3, 128], strides = [1, 1]} : vector<30x128xf32> to vector<3x128xf32>
    %c0_62 = arith.constant 0 : index
    %c21_63 = arith.constant 21 : index
    %c0_64 = arith.constant 0 : index
    %106 = vector.load %arg5[%c0_62, %c21_63, %c0_64] : memref<1x27x128xf32, #tpu.memory_space<vmem>>, vector<1x3x128xf32>
    %107 = vector.shape_cast %106 : vector<1x3x128xf32> to vector<3x128xf32>
    %108 = vector.shape_cast %105 : vector<3x128xf32> to vector<1x3x128xf32>
    tpu.vector_store %arg5[%c0_62, %c21_63, %c0_64], %108 {strides = array<i32>} : memref<1x27x128xf32, #tpu.memory_space<vmem>>, vector<1x3x128xf32>,
    %109 = vector.extract_strided_slice %32 {offsets = [27, 0], sizes = [3, 128], strides = [1, 1]} : vector<30x128xf32> to vector<3x128xf32>
    %c0_65 = arith.constant 0 : index
    %c24_66 = arith.constant 24 : index
    %c0_67 = arith.constant 0 : index
    %110 = vector.load %arg5[%c0_65, %c24_66, %c0_67] : memref<1x27x128xf32, #tpu.memory_space<vmem>>, vector<1x3x128xf32>
    %111 = vector.shape_cast %110 : vector<1x3x128xf32> to vector<3x128xf32>
    %112 = vector.shape_cast %109 : vector<3x128xf32> to vector<1x3x128xf32>
    tpu.vector_store %arg5[%c0_65, %c24_66, %c0_67], %112 {strides = array<i32>} : memref<1x27x128xf32, #tpu.memory_space<vmem>>, vector<1x3x128xf32>,
    return
  }
  func.func @transform_0(%arg0: i32, %arg1: i32) -> (i32, i32, i32) {
    %c0_i32 = arith.constant 0 : i32
    %c0_i32_0 = arith.constant 0 : i32
    return %arg0, %c0_i32, %arg1 : i32, i32, i32
  }
  func.func @transform_1(%arg0: i32, %arg1: i32) -> (i32, i32, i32) {
    %c0_i32 = arith.constant 0 : i32
    %c0_i32_0 = arith.constant 0 : i32
    return %arg0, %c0_i32, %arg1 : i32, i32, i32
  }
  func.func @transform_2(%arg0: i32, %arg1: i32) -> (i32, i32, i32) {
    %c0_i32 = arith.constant 0 : i32
    %c0_i32_0 = arith.constant 0 : i32
    return %arg0, %c0_i32, %arg1 : i32, i32, i32
  }
  func.func @transform_3(%arg0: i32, %arg1: i32) -> (i32, i32, i32) {
    %c0_i32 = arith.constant 0 : i32
    %c0_i32_0 = arith.constant 0 : i32
    return %arg0, %c0_i32, %arg1 : i32, i32, i32
  }
}

</mosaic_0001>

<bundles_post_ra>
// kernel: tpu_custom_call.1
= control target key start
LH: loop header
LB: loop body
LE: loop exit
PB: predicated region body
PF: predicated region fallthrough
CT: control target
= control target key end

     0   :  { %s1453_s12 = smov 0   ;;  %s1455_s13 = smov 0   ;;  %s1831_s0 = inlined_call_operand.vmem [shape: f32[2,3,128], index: 0, kind: input, shape index: {}]   ;;  %s1832_s1 = inlined_call_operand.vmem [shape: f32[2,3,128], index: 1, kind: input, shape index: {}]   ;;  %s1833_s2 = inlined_call_operand.vmem [shape: f32[2,39,128], index: 2, kind: output, shape index: {0}]   ;;  %s1834_s3 = inlined_call_operand.vmem [shape: f32[2,27,128], index: 3, kind: output, shape index: {1}]  }
   0x1   :  { %s1457_s14 = smov 0  }
   0x2 LB: > { %s26_s15 = sadd.s32 1, %s1421_s13  ;;  %p1299_p0 = scmp.ge.s32.totalorder %s1425_s14, 1  ;;  %s1425_s14 = sphi %s1457_s14, %s14_s14   ;;  %s1421_s13 = sphi %s1455_s13, %s1840_s13   ;;  %s1417_s12 = sphi %s1453_s12, %s1839_s12  }
   0x3   : > { %p28_p1 = scmp.ge.s32.totalorder %s26_s15, 2  ;;  %p174_p2 = scmp.lt.s32.totalorder %s1425_s14, 3 }
   0x5   : > { %s1842_s15 = smov (%p28_p1, %s26_s15), 0  ;;  %p175_p3 = pnand %p1299_p0, %p174_p2 }
   0x6   : > { %p218_p4 = scmp.lt.s32.totalorder (!%p175_p3), %s1417_s12, 1  ;;  %vm286_vm0 = vcmask (!%p175_p3), 1042432   ;;  %vm288_vm1 = vcmask (!%p175_p3), 1045504   ;;  %vm290_vm2 = vcmask (!%p175_p3), 1040384   ;;  %vm292_vm3 = vcmask (!%p175_p3), 1043456  }
   0x7   : > { %178 = sbr.rel (%p175_p3) target bundleno = 172 (0xac), region = 28  ;;  %vm296_vm4 = vcmask (!%p175_p3), 1041408   ;;  %vm294_vm5 = vcmask (!%p175_p3), 1046528   ;;  %vm298_vm6 = vcmask (!%p175_p3), 1044480   ;;  %v1427_v53 = vmov (!%p175_p3), 683565275  }
   0x8   : > { %v1428_v55 = vmov (!%p175_p3), 2475754826   ;;  %v1429_v57 = vmov (!%p175_p3), 2131351028   ;;  %v1430_v59 = vmov (!%p175_p3), 2102212464  }
   0x9   : > { %v1431_v61 = vmov (!%p175_p3), 920167782  }
   0xe   : > { %s1844_s12 = smov (!%p218_p4, %s1417_s12), 1 }
   0xf   : > { %s1300_s16 = sshll.u32 %s1844_s12, 2  ;;  %s1340_s17 = smul.u32 40, %s1844_s12 }
  0x10   : > { %s224_s20 = scalar_lea.vmem %s1831_s0, %s1300_s16  ;;  %s231_s23 = scalar_lea.vmem %s1832_s1, %s1300_s16 }
  0x11   : > { %s1480_s26 = scalar_lea.vmem %s1833_s2, %s1340_s17  ;;  %v248_v0 = vld [vmem:[%s224_s20] sm:$0x7]  ;;  %s1339_s27 = sshll.u32 %s1844_s12, 5 }
  0x12   : > { %v249_v1 = vld [vmem:[%s231_s23] sm:$0x7]  ;;  %250 = vst [vmem:[%s1480_s26] sm:$0x7] %v248_v0  ;;  %s1486_s30 = scalar_lea.vmem %s1834_s3, %s1339_s27  ;;  %v252_v5 = vmul.f32 3.1415927, %v248_v0 }
  0x13   : > { %v258_v2 = vmul.f32 3.1415927, %v249_v1  ;;  %v260_v3 = vmul.f32 12.566371, %v249_v1  ;;  %251 = vst [vmem:[%s1486_s30] sm:$0x7] %v249_v1 }
  0x14   : > { %v261_v4 = vmul.f32 25.132742, %v249_v1  ;;  %v253_v6 = vmul.f32 6.2831855, %v248_v0  ;;  %v259_v7 = vmul.f32 6.2831855, %v249_v1 }
  0x15   : > { %v254_v8 = vmul.f32 12.566371, %v248_v0  ;;  %v255_v9 = vmul.f32 25.132742, %v248_v0  ;;  %v256_v11 = vmul.f32 50.265484, %v248_v0 }
  0x16   : > { %v263_v10 = vrot.slane %v253_v6, 5  ;;  %v257_v12 = vmul.f32 100.53097, %v248_v0  ;;  %v284_v13 = vrot.slane %v261_v4, 5  ;;  %v278_v14 = vrot.slane %v258_v2, 6 }
  0x17   : > { %v266_v15 = vrot.slane %v254_v8, 2  ;;  %v269_v16 = vrot.slane %v255_v9, 7  ;;  %v272_v18 = vrot.slane %v256_v11, 4  ;;  %v281_v23 = vrot.slane %v259_v7, 3 }
  0x18   : > { %v287_v17 = vsel %vm286_vm0, %v252_v5, %v263_v10  ;;  %v275_v19 = vrot.slane %v257_v12, 1  ;;  %v1491_v20 = vsel %vm286_vm0, %v260_v3, %v284_v13  ;;  %v1432_v4 = vmov 1326507024  }
  0x19   : > { %v1494_v21 = vsel %vm288_vm1, %v287_v17, %v266_v15  ;;  %v291_v22 = vsel %vm290_vm2, %v266_v15, %v269_v16  ;;  %v616_v39 = vand.u32 2139095040, %v1491_v20 }
  0x1a   : > { %v301_v24 = vand.u32 2147483647, %v1494_v21  ;;  %v304_v25 = vand.u32 2139095040, %v1494_v21  ;;  %v293_v26 = vsel %vm292_vm3, %v291_v22, %v272_v18  ;;  %v297_v27 = vsel %vm296_vm4, %v275_v19, %v278_v14 }
  0x1b   : > { %v1502_v30 = vsel %vm294_vm5, %v293_v26, %v275_v19  ;;  %v1506_v34 = vsel %vm298_vm6, %v297_v27, %v281_v23  ;;  %v1514_v48 = vshrl.u32 %v616_v39, 23  ;;  %vm303_vm3 = vcmp.lt.s32.totalorder %v1494_v21, 0 }
  0x1c   : > { %v305_v28 = vshrl.u32 %v304_v25, 23  ;;  %v308_v29 = vand.u32 8388607, %v301_v24  ;;  %v405_v31 = vand.u32 2147483647, %v1502_v30  ;;  %v408_v32 = vand.u32 2139095040, %v1502_v30 }
  0x1d   : > { %v512_v42 = vand.u32 2139095040, %v1506_v34  ;;  %v509_v50 = vand.u32 2147483647, %v1506_v34  ;;  %vm1599_vm5 = vcmp.le.f32.partialorder %v301_v24, 0.7853982 }
  0x1e   : > { %v1305_v33 = vadd.s32 4294967169, %v305_v28  ;;  %v409_v35 = vshrl.u32 %v408_v32, 23  ;;  %v412_v36 = vand.u32 8388607, %v405_v31  ;;  %v309_v37 = vor.u32 8388608, %v308_v29 }
  0x1f   : > { %v1519_v51 = vshrl.u32 %v512_v42, 23 }
  0x20   : > { %v311_v38 = vadd.s32 1, %v1305_v33  ;;  %v1309_v40 = vadd.s32 4294967169, %v409_v35  ;;  %v413_v41 = vor.u32 8388608, %v412_v36  ;;  %v1512_v47 = vshll.u32 %v309_v37, 8 }
  0x22   : > { %vm312_vm7 = vcmp.gt.s32.totalorder %v311_v38, 0  ;;  %v415_v44 = vadd.s32 1, %v1309_v40  ;;  %v1516_v49 = vshll.u32 %v413_v41, 8 }
  0x23   : > { %v313_v43 = vsel %vm312_vm7, %v311_v38, 0  ;;  %vm407_vm7 = vcmp.lt.s32.totalorder %v1502_v30, 0 }
  0x24   : > { %v314_v45 = vshrl.u32 %v313_v43, 5  ;;  %v315_v46 = vand.u32 31, %v313_v43  ;;  %vm416_vm8 = vcmp.gt.s32.totalorder %v415_v44, 0 }
  0x25   : > { %v417_v9 = vsel %vm416_vm8, %v415_v44, 0 }
  0x26   : > { %v316_v52 = vsub.s32 32, %v315_v46  ;;  %v318_v54 = vshll.u32 %v1427_v53, %v315_v46  ;;  %v321_v56 = vshll.u32 %v1428_v55, %v315_v46  ;;  %v324_v58 = vshll.u32 %v1429_v57, %v315_v46 }
  0x27   : > { %v327_v60 = vshll.u32 %v1430_v59, %v315_v46  ;;  %v330_v62 = vshll.u32 %v1431_v61, %v315_v46  ;;  %vm333_vm9 = vcmp.lt.s32.totalorder %v314_v45, 1  ;;  %vm334_vm10 = vcmp.lt.s32.totalorder %v314_v45, 2 }
  0x28   : > { %v317_v63 = vshrl.u32 %v1427_v53, %v316_v52  ;;  %v319_v0 = vshrl.u32 %v1428_v55, %v316_v52  ;;  %v322_v1 = vshrl.u32 %v1429_v57, %v316_v52  ;;  %v325_v2 = vshrl.u32 %v1430_v59, %v316_v52 }
  0x29   : > { %v328_v3 = vshrl.u32 %v1431_v61, %v316_v52  ;;  %v331_v5 = vshrl.u32 %v1432_v4, %v316_v52  ;;  %vm335_vm11 = vcmp.lt.s32.totalorder %v314_v45, 3  ;;  %vm336_vm12 = vcmp.lt.s32.totalorder %v314_v45, 4 }
  0x2a   : > { %v320_v6 = vor.u32 %v319_v0, %v318_v54  ;;  %v323_v7 = vor.u32 %v322_v1, %v321_v56  ;;  %v326_v8 = vor.u32 %v325_v2, %v324_v58  ;;  %v418_v12 = vshrl.u32 %v417_v9, 5 }
  0x2b   : > { %v329_v10 = vor.u32 %v328_v3, %v327_v60  ;;  %v332_v11 = vor.u32 %v331_v5, %v330_v62  ;;  %v419_v13 = vand.u32 31, %v417_v9  ;;  %v1313_v62 = vadd.s32 4294967169, %v1519_v51 }
  0x2c   : > { %v337_v14 = vsel %vm333_vm9, %v317_v63, %v320_v6  ;;  %v338_v15 = vsel %vm336_vm12, %v326_v8, 2102212464  ;;  %v341_v16 = vsel %vm333_vm9, %v320_v6, %v323_v7  ;;  %v345_v17 = vsel %vm333_vm9, %v323_v7, %v326_v8 }
  0x2d   : > { %v339_v18 = vsel %vm335_vm11, %v323_v7, %v338_v15  ;;  %v342_v19 = vsel %vm336_vm12, %v329_v10, 920167782  ;;  %v346_v22 = vsel %vm336_vm12, %v332_v11, 1326507024  ;;  %v420_v23 = vsub.s32 32, %v419_v13 }
  0x2e   : > { %v340_v25 = vsel %vm334_vm10, %v337_v14, %v339_v18  ;;  %v343_v26 = vsel %vm335_vm11, %v326_v8, %v342_v19  ;;  %v347_v27 = vsel %vm335_vm11, %v329_v10, %v346_v22  ;;  %v422_v28 = vshll.u32 %v1427_v53, %v419_v13 }
  0x2f   : > { %v344_v29 = vsel %vm334_vm10, %v341_v16, %v343_v26  ;;  %v348_v32 = vsel %vm334_vm10, %v345_v17, %v347_v27  ;;  %v356_v33 = vmul.u32 %v1512_v47, %v340_v25  ;;  %v421_v35 = vshrl.u32 %v1427_v53, %v420_v23 }
  0x30   : > { %v1546_v36 = vmul.u32.u64.low %v1512_v47, %v348_v32  ;;  %v1547_v37 = vmul.u32.u64.high %v1512_v47, %v348_v32, %v1546_v36  ;;  %v1550_v38 = vmul.u32.u64.low %v1512_v47, %v344_v29  ;;  %v1551_v39 = vmul.u32.u64.high %v1512_v47, %v344_v29, %v1550_v38 }
  0x31   : > { %v423_v40 = vshrl.u32 %v1428_v55, %v420_v23  ;;  %v425_v41 = vshll.u32 %v1428_v55, %v419_v13  ;;  %v426_v42 = vshrl.u32 %v1429_v57, %v420_v23  ;;  %v428_v43 = vshll.u32 %v1429_v57, %v419_v13 }
  0x32   : > { %v429_v44 = vshrl.u32 %v1430_v59, %v420_v23  ;;  %v431_v45 = vshll.u32 %v1430_v59, %v419_v13  ;;  %v432_v46 = vshrl.u32 %v1431_v61, %v420_v23  ;;  %v434_v52 = vshll.u32 %v1431_v61, %v419_v13 }
  0x33   : > { %v424_v54 = vor.u32 %v423_v40, %v422_v28  ;;  %v427_v47 = vor.u32 %v426_v42, %v425_v41  ;;  %v435_v56 = vshrl.u32 %v1432_v4, %v420_v23  ;;  %vm437_vm13 = vcmp.lt.s32.totalorder %v418_v12, 1 }
  0x34   : > { %vm358_vm14 = vc.u32 %v1547_v37, %v1550_v38  ;;  %v359_v58 = vadd.s32 1, %v1551_v39  ;;  %v430_v60 = vor.u32 %v429_v44, %v428_v43  ;;  %v433_v63 = vor.u32 %v432_v46, %v431_v45 }
  0x35   : > { %v436_v0 = vor.u32 %v435_v56, %v434_v52  ;;  %vm438_vm15 = vcmp.lt.s32.totalorder %v418_v12, 2  ;;  %vm439_vm0 = vcmp.lt.s32.totalorder %v418_v12, 3  ;;  %vm440_vm1 = vcmp.lt.s32.totalorder %v418_v12, 4 }
  0x36   : > { %v360_v1 = vsel %vm358_vm14, %v359_v58, %v1551_v39  ;;  %v441_v2 = vsel %vm437_vm13, %v421_v35, %v424_v54  ;;  %v445_v3 = vsel %vm437_vm13, %v424_v54, %v427_v47  ;;  %v442_v6 = vsel %vm440_vm1, %v430_v60, 2102212464 }
  0x37   : > { %v361_v5 = vadd.s32 %v360_v1, %v356_v33  ;;  %v446_v7 = vsel %vm440_vm1, %v433_v63, 920167782  ;;  %v449_v8 = vsel %vm437_vm13, %v427_v47, %v430_v60  ;;  %v443_v9 = vsel %vm439_vm0, %v427_v47, %v442_v6 }
  0x38   : > { %v447_v10 = vsel %vm439_vm0, %v430_v60, %v446_v7  ;;  %v450_v11 = vsel %vm440_vm1, %v436_v0, 1326507024  ;;  %v519_v51 = vadd.s32 1, %v1313_v62  ;;  %v1317_v16 = vadd.s32 4294967169, %v1514_v48 }
  0x39   : > { %v362_v13 = vadd.s32 536870912, %v361_v5  ;;  %v448_v14 = vsel %vm438_vm15, %v445_v3, %v447_v10  ;;  %v451_v15 = vsel %vm439_vm0, %v433_v63, %v450_v11  ;;  %v444_v17 = vsel %vm438_vm15, %v441_v2, %v443_v9 }
  0x3a   : > { %v452_v18 = vsel %vm438_vm15, %v449_v8, %v451_v15  ;;  %v1576_v19 = vmul.u32.u64.low %v1516_v49, %v448_v14  ;;  %v1577_v22 = vmul.u32.u64.high %v1516_v49, %v448_v14, %v1576_v19  ;;  %vm520_vm2 = vcmp.gt.s32.totalorder %v519_v51, 0 }
  0x3b   : > { %v363_v23 = vshrl.u32 %v362_v13, 30  ;;  %v1580_v25 = vmul.u32.u64.low %v1516_v49, %v452_v18  ;;  %v1581_v26 = vmul.u32.u64.high %v1516_v49, %v452_v18, %v1580_v25  ;;  %v521_v27 = vsel %vm520_vm2, %v519_v51, 0 }
  0x3c   : > { %v613_v28 = vand.u32 2147483647, %v1491_v20  ;;  %v460_v48 = vmul.u32 %v1516_v49, %v444_v17  ;;  %v516_v12 = vand.u32 8388607, %v509_v50  ;;  %v463_v33 = vadd.s32 1, %v1577_v22 }
  0x3d   : > { %v364_v29 = vshll.u32 %v363_v23, 30  ;;  %v387_v32 = vsub.s32 4, %v363_v23  ;;  %v623_v35 = vadd.s32 1, %v1317_v16  ;;  %vm462_vm4 = vc.u32 %v1581_v26, %v1576_v19 }
  0x3e   : > { %v523_v39 = vand.u32 31, %v521_v27  ;;  %v464_v41 = vsel %vm462_vm4, %v463_v33, %v1577_v22  ;;  %v1595_v49 = vand.u32 8388607, %v613_v28  ;;  %v517_v44 = vor.u32 8388608, %v516_v12 }
  0x3f   : > { %v365_v36 = vsub.s32 %v361_v5, %v364_v29  ;;  %v388_v40 = vsel %vm303_vm3, %v387_v32, %v363_v23  ;;  %v465_v43 = vadd.s32 %v464_v41, %v460_v48  ;;  %vm624_vm6 = vcmp.gt.s32.totalorder %v623_v35, 0 }
  0x40   : > { %v390_v52 = vsel %vm1599_vm5, 0, %v388_v40  ;;  %v524_v54 = vsub.s32 32, %v523_v39  ;;  %v357_v47 = vadd.s32 %v1550_v38, %v1547_v37  ;;  %v621_v58 = vor.u32 8388608, %v1595_v49 }
  0x41   : > { %v367_v42 = vsub.s32 0, %v365_v36  ;;  %v466_v56 = vadd.s32 536870912, %v465_v43  ;;  %v1608_v62 = vshrl.u32 %v521_v27, 5  ;;  %v1610_v63 = vshll.u32 %v517_v44, 8 }
  0x42   : > { %v1612_v24 = vsel %vm624_vm6, %v623_v35, 0  ;;  %v394_v0 = vadd.s32 3, %v390_v52  ;;  %v1615_v1 = vadd.s32 %v1576_v19, %v1581_v26  ;;  %v526_v3 = vshll.u32 %v1427_v53, %v523_v39 }
  0x43   : > { %v1306_v46 = vmin.u32 %v367_v42, %v365_v36  ;;  %v467_v2 = vshrl.u32 %v466_v56, 30  ;;  %v1618_v6 = vand.u32 3, %v390_v52  ;;  %v532_v37 = vshll.u32 %v1429_v57, %v523_v39 }
  0x44   : > { %v533_v38 = vshrl.u32 %v1430_v59, %v524_v54  ;;  %v527_v8 = vshrl.u32 %v1428_v55, %v524_v54  ;;  %v529_v9 = vshll.u32 %v1428_v55, %v523_v39  ;;  %v530_v10 = vshrl.u32 %v1429_v57, %v524_v54 }
  0x45   : > { %v369_v60 = vclz %v1306_v46  ;;  %v468_v7 = vshll.u32 %v467_v2, 30  ;;  %v525_v11 = vshrl.u32 %v1427_v53, %v524_v54  ;;  %v535_v51 = vshll.u32 %v1430_v59, %v523_v39 }
  0x46   : > { %v536_v13 = vshrl.u32 %v1431_v61, %v524_v54  ;;  %v538_v16 = vshll.u32 %v1431_v61, %v523_v39  ;;  %v539_v17 = vshrl.u32 %v1432_v4, %v524_v54  ;;  %v534_v23 = vor.u32 %v533_v38, %v532_v37 }
  0x47   : > { %v1307_v5 = vadd.s32 4294967294, %v369_v60  ;;  %v1629_v15 = vsub.s32 %v465_v43, %v468_v7  ;;  %v528_v26 = vor.u32 %v527_v8, %v526_v3  ;;  %v531_v27 = vor.u32 %v530_v10, %v529_v9 }
  0x48   : > { %vm544_vm9 = vcmp.lt.s32.totalorder %v1608_v62, 4  ;;  %v491_v48 = vsub.s32 4, %v467_v2  ;;  %v537_v35 = vor.u32 %v536_v13, %v535_v51  ;;  %v540_v39 = vor.u32 %v539_v17, %v538_v16 }
  0x49   : > { %vm1308_vm8 = vcmp.lt.s32.totalorder %v1307_v5, 0  ;;  %v471_v25 = vsub.s32 0, %v1629_v15  ;;  %v546_v12 = vsel %vm544_vm9, %v534_v23, 2102212464  ;;  %vm541_vm10 = vcmp.lt.s32.totalorder %v1608_v62, 1 }
  0x4a   : > { %v372_v14 = vsel %vm1308_vm8, 0, %v1307_v5  ;;  %v1639_v41 = vand.u32 3, %v394_v0  ;;  %vm543_vm11 = vcmp.lt.s32.totalorder %v1608_v62, 3  ;;  %vm542_vm12 = vcmp.lt.s32.totalorder %v1608_v62, 2 }
  0x4b   : > { %v373_v18 = vsub.s32 32, %v372_v14  ;;  %v374_v19 = vshll.u32 %v365_v36, %v372_v14  ;;  %v377_v22 = vsub.s32 4294967266, %v372_v14  ;;  %v1310_v33 = vmin.u32 %v471_v25, %v1629_v15 }
  0x4c   : > { %v545_v43 = vsel %vm541_vm10, %v525_v11, %v528_v26  ;;  %v547_v44 = vsel %vm543_vm11, %v531_v27, %v546_v12  ;;  %v1647_v54 = vsel %vm407_vm7, %v491_v48, %v467_v2  ;;  %v550_v60 = vsel %vm544_vm9, %v537_v35, 920167782 }
  0x4d   : > { %v375_v29 = vshrl.u32 %v357_v47, %v373_v18  ;;  %v378_v32 = vadd.s32 127, %v377_v22  ;;  %v473_v42 = vclz %v1310_v33  ;;  %v549_v47 = vsel %vm541_vm10, %v528_v26, %v531_v27 }
  0x4e   : > { %v553_v0 = vsel %vm541_vm10, %v531_v27, %v534_v23  ;;  %v554_v3 = vsel %vm544_vm9, %v540_v39, 1326507024  ;;  %v548_v37 = vsel %vm542_vm12, %v545_v43, %v547_v44  ;;  %v551_v38 = vsel %vm543_vm11, %v534_v23, %v550_v60 }
  0x4f   : > { %v376_v36 = vor.u32 %v375_v29, %v374_v19  ;;  %v379_v40 = vshll.u32 %v378_v32, 23  ;;  %v1311_v56 = vadd.s32 4294967294, %v473_v42  ;;  %v555_v2 = vsel %vm543_vm11, %v537_v35, %v554_v3 }
  0x50   : > { %v552_v7 = vsel %vm542_vm12, %v549_v47, %v551_v38  ;;  %v556_v8 = vsel %vm542_vm12, %v553_v0, %v555_v2  ;;  %v1664_v9 = vshrl.u32 %v1612_v24, 5  ;;  %v627_v18 = vand.u32 31, %v1612_v24 }
  0x51   : > { %v380_v46 = vor.u32 4788187, %v379_v40  ;;  %v383_v52 = vcvt.s32.f32 %v376_v36  ;;  %vm1312_vm13 = vcmp.lt.s32.totalorder %v1311_v56, 0  ;;  %v564_v23 = vmul.u32 %v1610_v63, %v548_v37 }
  0x52   : > { %v476_v11 = vsel %vm1312_vm13, 0, %v1311_v56  ;;  %v1667_v51 = vmul.u32.u64.low %v1610_v63, %v556_v8  ;;  %v1668_v13 = vmul.u32.u64.high %v1610_v63, %v556_v8, %v1667_v51  ;;  %v628_v27 = vsub.s32 32, %v627_v18 }
  0x53   : > { %v381_v5 = vand.u32 2147483647, %v380_v46  ;;  %v477_v14 = vsub.s32 32, %v476_v11  ;;  %v478_v16 = vshll.u32 %v1629_v15, %v476_v11  ;;  %v481_v17 = vsub.s32 4294967266, %v476_v11 }
  0x54   : > { %v1673_v22 = vmul.u32.u64.low %v1610_v63, %v552_v7  ;;  %v1674_v62 = vmul.u32.u64.high %v1610_v63, %v552_v7, %v1673_v22  ;;  %vm645_vm14 = vcmp.lt.s32.totalorder %v1664_v9, 1  ;;  %v630_v24 = vshll.u32 %v1427_v53, %v627_v18 }
  0x55   : > { %v384_v10 = vmul.f32 %v383_v52, %v381_v5  ;;  %v479_v25 = vshrl.u32 %v1615_v1, %v477_v14  ;;  %v482_v26 = vadd.s32 127, %v481_v17  ;;  %v633_v29 = vshll.u32 %v1428_v55, %v627_v18 }
  0x56   : > { %vm566_vm15 = vc.u32 %v1668_v13, %v1673_v22  ;;  %vm1691_vm0 = vcmp.le.f32.partialorder %v405_v31, 0.7853982  ;;  %v629_v12 = vshrl.u32 %v1427_v53, %v628_v27  ;;  %v567_v33 = vadd.s32 1, %v1674_v62 }
  0x57   : > { %v385_v19 = vxor.u32 2147483648, %v384_v10  ;;  %v480_v32 = vor.u32 %v479_v25, %v478_v16  ;;  %v483_v48 = vshll.u32 %v482_v26, 23  ;;  %v631_v35 = vshrl.u32 %v1428_v55, %v628_v27 }
  0x58   : > { %v634_v39 = vshrl.u32 %v1429_v57, %v628_v27  ;;  %v636_v40 = vshll.u32 %v1429_v57, %v627_v18  ;;  %vm815_vm1 = vcmp.eq.s32.totalorder %v1618_v6, 2  ;;  %v568_v31 = vsel %vm566_vm15, %v567_v33, %v1674_v62 }
  0x59   : > { %v386_v15 = vsel %vm303_vm3, %v385_v19, %v384_v10  ;;  %v484_v45 = vor.u32 4788187, %v483_v48  ;;  %v487_v36 = vcvt.s32.f32 %v480_v32  ;;  %v632_v53 = vor.u32 %v631_v35, %v630_v24 }
  0x5a   : > { %v389_v63 = vsel %vm1599_vm5, %v1494_v21, %v386_v15  ;;  %v635_v42 = vor.u32 %v634_v39, %v633_v29  ;;  %v637_v43 = vshrl.u32 %v1430_v59, %v628_v27  ;;  %vm812_vm2 = vcmp.eq.s32.totalorder %v1618_v6, 0 }
  0x5b   : > { %1387 = vcosq.f32 %v389_v63  ;;  %v485_v55 = vand.u32 2147483647, %v484_v45  ;;  %v569_v44 = vadd.s32 %v568_v31, %v564_v23  ;;  %v639_v46 = vshll.u32 %v1430_v59, %v627_v18 }
  0x5c   : > { %1389 = vsinq.f32 %v389_v63  ;;  %v640_v52 = vshrl.u32 %v1431_v61, %v628_v27  ;;  %vm396_vm3 = vcmp.lt.s32.totalorder %v1639_v41, 2  ;;  %vm811_vm4 = vcmp.lt.s32.totalorder %v1618_v6, 2 }
  0x5d   : > { %v638_v57 = vor.u32 %v637_v43, %v636_v40  ;;  %v642_v47 = vshll.u32 %v1431_v61, %v627_v18  ;;  %v643_v56 = vshrl.u32 %v1432_v4, %v628_v27  ;;  %vm646_vm5 = vcmp.lt.s32.totalorder %v1664_v9, 2 }
  0x5e   : > { %v488_v60 = vmul.f32 %v487_v36, %v485_v55  ;;  %v570_v0 = vadd.s32 536870912, %v569_v44  ;;  %v641_v3 = vor.u32 %v640_v52, %v639_v46  ;;  %vm647_vm6 = vcmp.lt.s32.totalorder %v1664_v9, 3 }
  0x5f   : > { %v644_v5 = vor.u32 %v643_v56, %v642_v47  ;;  %vm648_vm8 = vcmp.lt.s32.totalorder %v1664_v9, 4  ;;  %v649_v59 = vsel %vm645_vm14, %v629_v12, %v632_v53  ;;  %v653_v37 = vsel %vm645_vm14, %v632_v53, %v635_v42 }
  0x60   : > { %v489_v38 = vxor.u32 2147483648, %v488_v60  ;;  %v1720_v61 = vshrl.u32 %v570_v0, 30  ;;  %v650_v4 = vsel %vm648_vm8, %v638_v57, 2102212464  ;;  %v654_v2 = vsel %vm648_vm8, %v641_v3, 920167782 }
  0x61   : > { %v651_v7 = vsel %vm647_vm6, %v635_v42, %v650_v4  ;;  %v655_v8 = vsel %vm647_vm6, %v638_v57, %v654_v2  ;;  %v657_v10 = vsel %vm645_vm14, %v635_v42, %v638_v57  ;;  %v658_v11 = vsel %vm648_vm8, %v644_v5, 1326507024 }
  0x62   : > { %v490_v51 = vsel %vm407_vm7, %v489_v38, %v488_v60  ;;  %v494_v14 = vsel %vm1691_vm0, 0, %v1647_v54  ;;  %v572_v16 = vshll.u32 %v1720_v61, 30  ;;  %v1736_v17 = vsel %vm646_vm5, %v649_v59, %v651_v7 }
  0x63   : > { %vm400_vm9 = vcmp.eq.s32.totalorder %v1639_v41, 2  ;;  %v493_v19 = vsel %vm1691_vm0, %v1502_v30, %v490_v51  ;;  %v656_v62 = vsel %vm646_vm5, %v653_v37, %v655_v8  ;;  %v659_v23 = vsel %vm647_vm6, %v641_v3, %v658_v11 }
  0x64   : > { %vm397_vm7 = vcmp.eq.s32.totalorder %v1639_v41, 0  ;;  %1391 = vcosq.f32 %v493_v19  ;;  %v573_v26 = vsub.s32 %v569_v44, %v572_v16  ;;  %v498_v15 = vadd.s32 3, %v494_v14 }
  0x65   : > { %v1388_v18 = vpop.eup %1387  ;;  %1393 = vsinq.f32 %v493_v19  ;;  %v660_v24 = vsel %vm646_vm5, %v657_v10, %v659_v23  ;;  %vm393_vm10 = vweird.f32 %v1494_v21  ;;  %v661_v12 = vshll.u32 %v621_v58, 8 }
  0x66   : > { %v1390_v54 = vpop.eup %1389  ;;  %v401_v25 = vxor.u32 2147483648, %v1388_v18  ;;  %v575_v1 = vsub.s32 0, %v573_v26  ;;  %v499_v45 = vand.u32 3, %v498_v15  ;;  %v913_v36 = vand.u32 3, %v494_v14 }
  0x67   : > { %v398_v27 = vxor.u32 2147483648, %v1390_v54  ;;  %v1764_v31 = vmul.u32.u64.low %v661_v12, %v660_v24  ;;  %v1765_v53 = vmul.u32.u64.high %v661_v12, %v660_v24, %v1764_v31  ;;  %vm497_vm11 = vweird.f32 %v1502_v30 }
  0x68   : > { %v402_v29 = vsel %vm400_vm9, %v401_v25, %v1390_v54  ;;  %v817_v63 = vsel %vm815_vm1, %v401_v25, %v1390_v54  ;;  %v1314_v33 = vmin.u32 %v575_v1, %v573_v26  ;;  %vm500_vm12 = vcmp.lt.s32.totalorder %v499_v45, 2 }
  0x69   : > { %v399_v32 = vsel %vm397_vm7, %v1388_v18, %v398_v27  ;;  %v814_v48 = vsel %vm812_vm2, %v1388_v18, %v398_v27  ;;  %v1768_v58 = vmul.u32.u64.low %v661_v12, %v656_v62  ;;  %v1769_v41 = vmul.u32.u64.high %v661_v12, %v656_v62, %v1768_v58 }
  0x6a   : > { %v403_v9 = vsel %vm396_vm3, %v399_v32, %v402_v29  ;;  %v818_v21 = vsel %vm811_vm4, %v814_v48, %v817_v63  ;;  %v577_v40 = vclz %v1314_v33  ;;  %vm914_vm13 = vcmp.lt.s32.totalorder %v913_v36, 2 }
  0x6b   : > { %v404_v35 = vsel %vm393_vm10, nan, %v403_v9  ;;  %v819_v39 = vsel %vm393_vm10, nan, %v818_v21  ;;  %vm915_vm14 = vcmp.eq.s32.totalorder %v913_v36, 0  ;;  %vm918_vm15 = vcmp.eq.s32.totalorder %v913_v36, 2 }
  0x6c   : > { %1129 = vst [vmem:[%s1480_s26 + $0x3] ss:$10 sps:$4 sm:$0xc7] %v404_v35   ;;  %1131 = vst [vmem:[%s1480_s26 + $0x6] sm:$0x38] %v404_v35  ;;  %v1315_v49 = vadd.s32 4294967294, %v577_v40  ;;  %v565_v42 = vadd.s32 %v1673_v22, %v1668_v13  ;;  %v1774_v46 = vadd.s32 %v1768_v58, %v1765_v53  ;;  %vm670_vm3 = vc.u32 %v1765_v53, %v1768_v58 }
  0x6d   : > { %1130 = vst [vmem:[%s1480_s26 + $0x6] ss:$10 sps:$4 sm:$0xc7] %v819_v39   ;;  %1132 = vst [vmem:[%s1480_s26 + $0x9] sm:$0x38] %v819_v39  ;;  %vm501_vm0 = vcmp.eq.s32.totalorder %v499_v45, 0  ;;  %v668_v13 = vmul.u32 %v661_v12, %v1736_v17 }
  0x6e   : > { %v1392_v6 = vpop.eup %1391  ;;  %vm504_vm1 = vcmp.eq.s32.totalorder %v499_v45, 2  ;;  %vm1316_vm2 = vcmp.lt.s32.totalorder %v1315_v49, 0  ;;  %v671_v22 = vadd.s32 1, %v1769_v41  ;;  %v595_v19 = vsub.s32 4, %v1720_v61 }
  0x6f   : > { %v1394_v43 = vpop.eup %1393  ;;  %v505_v55 = vxor.u32 2147483648, %v1392_v6  ;;  %v580_v44 = vsel %vm1316_vm2, 0, %v1315_v49  ;;  %vm511_vm4 = vcmp.lt.s32.totalorder %v1506_v34, 0  ;;  %vm510_vm5 = vcmp.le.f32.partialorder %v509_v50, 0.7853982 }
  0x70   : > { %v502_v52 = vxor.u32 2147483648, %v1394_v43  ;;  %v581_v57 = vsub.s32 32, %v580_v44  ;;  %v582_v47 = vshll.u32 %v573_v26, %v580_v44  ;;  %v585_v56 = vsub.s32 4294967266, %v580_v44 }
  0x71   : > { %v506_v60 = vsel %vm504_vm1, %v505_v55, %v1394_v43  ;;  %v920_v0 = vsel %vm918_vm15, %v505_v55, %v1394_v43  ;;  %v672_v2 = vsel %vm670_vm3, %v671_v22, %v1769_v41  ;;  %v596_v25 = vsel %vm511_vm4, %v595_v19, %v1720_v61 }
  0x72   : > { %v503_v3 = vsel %vm501_vm0, %v1392_v6, %v502_v52  ;;  %v917_v5 = vsel %vm915_vm14, %v1392_v6, %v502_v52  ;;  %v583_v59 = vshrl.u32 %v565_v42, %v581_v57  ;;  %v586_v37 = vadd.s32 127, %v585_v56 }
  0x73   : > { %v507_v38 = vsel %vm500_vm12, %v503_v3, %v506_v60  ;;  %v921_v4 = vsel %vm914_vm13, %v917_v5, %v920_v0  ;;  %v673_v51 = vadd.s32 %v672_v2, %v668_v13  ;;  %v598_v24 = vsel %vm510_vm5, 0, %v596_v25 }
  0x74   : > { %v508_v7 = vsel %vm497_vm11, nan, %v507_v38  ;;  %v922_v8 = vsel %vm497_vm11, nan, %v921_v4  ;;  %v584_v10 = vor.u32 %v583_v59, %v582_v47  ;;  %v587_v11 = vshll.u32 %v586_v37, 23 }
  0x75   : > { %1134 = vst [vmem:[%s1480_s26 + $0x11] ss:$10 sps:$4 sm:$0x71] %v508_v7   ;;  %1137 = vst [vmem:[%s1480_s26 + $0x14] ss:$10 sps:$4 sm:$0x8e] %v508_v7   ;;  %vm601_vm11 = vweird.f32 %v1506_v34 }
  0x76   : > { %1136 = vst [vmem:[%s1480_s26 + $0x14] ss:$10 sps:$4 sm:$0x71] %v922_v8   ;;  %1138 = vst [vmem:[%s1480_s26 + $0x17] ss:$10 sps:$4 sm:$0x8e] %v922_v8   ;;  %v591_v16 = vcvt.s32.f32 %v584_v10 }
  0x77   : > { %v588_v14 = vor.u32 4788187, %v587_v11  ;;  %v674_v17 = vadd.s32 536870912, %v673_v51  ;;  %v602_v1 = vadd.s32 3, %v598_v24  ;;  %v1016_v9 = vand.u32 3, %v598_v24 }
  0x78   : > { %vm615_vm14 = vcmp.lt.s32.totalorder %v1491_v20, 0  ;;  %vm614_vm15 = vcmp.le.f32.partialorder %v613_v28, 0.7853982 }
  0x79   : > { %v589_v18 = vand.u32 2147483647, %v588_v14  ;;  %v1794_v62 = vshrl.u32 %v674_v17, 30  ;;  %v603_v12 = vand.u32 3, %v602_v1  ;;  %vm1018_vm9 = vcmp.eq.s32.totalorder %v1016_v9, 0 }
  0x7a   : > { %vm1021_vm7 = vcmp.eq.s32.totalorder %v1016_v9, 2  ;;  %vm1017_vm13 = vcmp.lt.s32.totalorder %v1016_v9, 2 }
  0x7b   : > { %v592_v23 = vmul.f32 %v591_v16, %v589_v18  ;;  %v676_v30 = vshll.u32 %v1794_v62, 30  ;;  %vm608_vm8 = vcmp.eq.s32.totalorder %v603_v12, 2  ;;  %vm605_vm10 = vcmp.eq.s32.totalorder %v603_v12, 0 }
  0x7c   : > { %vm604_vm12 = vcmp.lt.s32.totalorder %v603_v12, 2  ;;  %v699_v47 = vsub.s32 4, %v1794_v62 }
  0x7d   : > { %v593_v54 = vxor.u32 2147483648, %v592_v23  ;;  %v677_v26 = vsub.s32 %v673_v51, %v676_v30 }
  0x7e   : > { %v700_v0 = vsel %vm615_vm14, %v699_v47, %v1794_v62 }
  0x7f   : > { %v594_v27 = vsel %vm511_vm4, %v593_v54, %v592_v23  ;;  %v679_v29 = vsub.s32 0, %v677_v26  ;;  %v702_v3 = vsel %vm614_vm15, 0, %v700_v0 }
  0x80   : > { %v597_v15 = vsel %vm510_vm5, %v1506_v34, %v594_v27  ;;  %v706_v5 = vadd.s32 3, %v702_v3  ;;  %v1119_v37 = vand.u32 3, %v702_v3 }
  0x81   : > { %1395 = vcosq.f32 %v597_v15  ;;  %v1318_v63 = vmin.u32 %v679_v29, %v677_v26 }
  0x82   : > { %1397 = vsinq.f32 %v597_v15  ;;  %v707_v59 = vand.u32 3, %v706_v5  ;;  %vm1124_vm1 = vcmp.eq.s32.totalorder %v1119_v37, 2  ;;  %vm1121_vm3 = vcmp.eq.s32.totalorder %v1119_v37, 0 }
  0x83   : > { %v681_v32 = vclz %v1318_v63  ;;  %vm1120_vm5 = vcmp.lt.s32.totalorder %v1119_v37, 2 }
  0x84   : > { %vm712_vm0 = vcmp.eq.s32.totalorder %v707_v59, 2  ;;  %vm709_vm2 = vcmp.eq.s32.totalorder %v707_v59, 0  ;;  %vm708_vm4 = vcmp.lt.s32.totalorder %v707_v59, 2 }
  0x85   : > { %v1319_v48 = vadd.s32 4294967294, %v681_v32 }
  0x87   : > { %vm1320_vm6 = vcmp.lt.s32.totalorder %v1319_v48, 0 }
  0x88   : > { %v684_v21 = vsel %vm1320_vm6, 0, %v1319_v48  ;;  %vm705_vm6 = vweird.f32 %v1491_v20 }
  0x89   : > { %v685_v50 = vsub.s32 32, %v684_v21  ;;  %v686_v33 = vshll.u32 %v677_v26, %v684_v21  ;;  %v689_v35 = vsub.s32 4294967266, %v684_v21 }
  0x8b   : > { %v1396_v61 = vpop.eup %1395  ;;  %v687_v36 = vshrl.u32 %v1774_v46, %v685_v50  ;;  %v690_v40 = vadd.s32 127, %v689_v35 }
  0x8c   : > { %v1398_v39 = vpop.eup %1397  ;;  %v609_v45 = vxor.u32 2147483648, %v1396_v61 }
  0x8d   : > { %v606_v31 = vxor.u32 2147483648, %v1398_v39  ;;  %v688_v58 = vor.u32 %v687_v36, %v686_v33  ;;  %v691_v41 = vshll.u32 %v690_v40, 23 }
  0x8e   : > { %v610_v53 = vsel %vm608_vm8, %v609_v45, %v1398_v39  ;;  %v1023_v49 = vsel %vm1021_vm7, %v609_v45, %v1398_v39 }
  0x8f   : > { %v607_v6 = vsel %vm605_vm10, %v1396_v61, %v606_v31  ;;  %v1020_v42 = vsel %vm1018_vm9, %v1396_v61, %v606_v31  ;;  %v692_v44 = vor.u32 4788187, %v691_v41  ;;  %v695_v34 = vcvt.s32.f32 %v688_v58 }
  0x90   : > { %v611_v43 = vsel %vm604_vm12, %v607_v6, %v610_v53  ;;  %v1024_v55 = vsel %vm1017_vm13, %v1020_v42, %v1023_v49 }
  0x91   : > { %v612_v46 = vsel %vm601_vm11, nan, %v611_v43  ;;  %v1025_v52 = vsel %vm601_vm11, nan, %v1024_v55  ;;  %v693_v57 = vand.u32 2147483647, %v692_v44 }
  0x92   : > { %1142 = vst [vmem:[%s1480_s26 + $0x22] sm:$0x3] %v612_v46  ;;  %1145 = vst [vmem:[%s1486_s30 + $0x1] sm:$0x1c] %v612_v46 }
  0x93   : > { %1147 = vst [vmem:[%s1486_s30 + $0x4] sm:$0xe0] %v612_v46  ;;  %1144 = vst [vmem:[%s1480_s26 + $0x25] sm:$0x3] %v1025_v52  ;;  %v696_v56 = vmul.f32 %v695_v34, %v693_v57 }
  0x94   : > { %1146 = vst [vmem:[%s1486_s30 + $0x4] sm:$0x1c] %v1025_v52  ;;  %1148 = vst [vmem:[%s1486_s30 + $0x7] sm:$0xe0] %v1025_v52 }
  0x95   : > { %v697_v60 = vxor.u32 2147483648, %v696_v56 }
  0x97   : > { %v698_v13 = vsel %vm615_vm14, %v697_v60, %v696_v56 }
  0x98   : > { %v701_v22 = vsel %vm614_vm15, %v1491_v20, %v698_v13 }
  0x99   : > { %1399 = vcosq.f32 %v701_v22 }
  0x9a   : > { %1401 = vsinq.f32 %v701_v22 }
  0xa3   : > { %v1400_v38 = vpop.eup %1399 }
  0xa4   : > { %v1402_v4 = vpop.eup %1401  ;;  %v713_v28 = vxor.u32 2147483648, %v1400_v38 }
  0xa5   : > { %v710_v2 = vxor.u32 2147483648, %v1402_v4 }
  0xa6   : > { %v714_v7 = vsel %vm712_vm0, %v713_v28, %v1402_v4  ;;  %v1126_v8 = vsel %vm1124_vm1, %v713_v28, %v1402_v4 }
  0xa7   : > { %v711_v10 = vsel %vm709_vm2, %v1400_v38, %v710_v2  ;;  %v1123_v11 = vsel %vm1121_vm3, %v1400_v38, %v710_v2 }
  0xa8   : > { %v715_v51 = vsel %vm708_vm4, %v711_v10, %v714_v7  ;;  %v1127_v14 = vsel %vm1120_vm5, %v1123_v11, %v1126_v8 }
  0xa9   : > { %v716_v16 = vsel %vm705_vm6, nan, %v715_v51  ;;  %v1128_v17 = vsel %vm705_vm6, nan, %v1127_v14 }
  0xaa   : > { %1149 = vst [vmem:[%s1486_s30 + $0xf] sm:$0x7] %v716_v16  ;;  %1151 = vst [vmem:[%s1486_s30 + $0x12] sm:$0x38] %v716_v16 }
  0xab   : > { %1150 = vst [vmem:[%s1486_s30 + $0x12] sm:$0x7] %v1128_v17  ;;  %1152 = vst [vmem:[%s1486_s30 + $0x15] sm:$0x38] %v1128_v17 }
  0xac PF: > { %s14_s14 = sadd.s32 1, %s1425_s14   ;;  %s1839_s12 = smov %s1421_s13 }
  0xad   : > { %p11_p5 = scmp.ge.s32.totalorder %s14_s14, 4   ;;  %s1840_s13 = smov %s1842_s15 }
  0xaf   :  { %13 = sbr.rel (!%p11_p5) target bundleno = 2 (0x2), region = 73 }

</bundles_post_ra>
